<compile_context>
chip_gen: v7x
topology: tpu7x:2x2x1
jax: 0.10.0
libtpu: 0.0.40
codegen_flags: <defaults>
</compile_context>

<pallas_src>
import jax
import jax.numpy as jnp
from jax.experimental import pallas as pl
from jax.experimental.pallas import tpu as pltpu

LANE = 128            # TPU lane width (minor dim of every tile)
MAX_BLOCK_ROWS = 32   # sublane rows per grid step -> 32 * 128 = 4096 points / step


def _pose_graph_disp_kernel(params_ref, in_ref, out_ref):
    # params_ref (SMEM f32[17]): [r00..r22 row-major, tx, ty, tz, fx, fy, cx, cy, fx*b]
    # in_ref  (VMEM f32[6, SUB, 128]): rows = [x_w, y_w, z_w, kp_u, kp_v, disparity]
    # out_ref (VMEM f32[3, SUB, 128]): rows = [u_err, v_err, disp_err]
    r00 = params_ref[0]; r01 = params_ref[1]; r02 = params_ref[2]
    r10 = params_ref[3]; r11 = params_ref[4]; r12 = params_ref[5]
    r20 = params_ref[6]; r21 = params_ref[7]; r22 = params_ref[8]
    tx = params_ref[9];  ty = params_ref[10]; tz = params_ref[11]
    fx = params_ref[12]; fy = params_ref[13]
    cx = params_ref[14]; cy = params_ref[15]
    fxb = params_ref[16]

    # world-frame point components, sublane-dense (SUB, 128) tiles
    dx = in_ref[0] - tx
    dy = in_ref[1] - ty
    dz = in_ref[2] - tz

    # camera-frame coords: R^T @ (p_w - t)
    xc = r00 * dx + r10 * dy + r20 * dz
    yc = r01 * dx + r11 * dy + r21 * dz
    zc = r02 * dx + r12 * dy + r22 * dz

    # reciprocal on the EUP (its own VLIW slot); forward depth is the NED x component
    inv_x = pl.reciprocal(xc, approx=False)

    # each write is a full-vreg (SUB, 128) unmasked store
    out_ref[0] = fx * yc * inv_x + cx - in_ref[3]   # reproj err (u)
    out_ref[1] = fy * zc * inv_x + cy - in_ref[4]   # reproj err (v)
    out_ref[2] = fxb * inv_x - in_ref[5]            # disparity err


def _quat_to_rotmat(q):
    # q = (qx, qy, qz, qw), pypose convention
    x, y, z, w = q[0], q[1], q[2], q[3]
    return jnp.array(
        [
            [1 - 2 * (y * y + z * z), 2 * (x * y - z * w), 2 * (x * z + y * w)],
            [2 * (x * y + z * w), 1 - 2 * (x * x + z * z), 2 * (y * z - x * w)],
            [2 * (x * z - y * w), 2 * (y * z + x * w), 1 - 2 * (x * x + y * y)],
        ],
        dtype=jnp.float32,
    )


@jax.jit
def pose_graph_disparity_forward(pose7, pos_Tw, kp2, kp2_disp, K, baseline):
    """pose7: (7,) [tx,ty,tz,qx,qy,qz,qw]; pos_Tw: (N,3); kp2: (N,2); kp2_disp: (N,1);
    K: (3,3); baseline: scalar.  Returns (N, 3) = [u_err, v_err, disp_err]."""
    N = pos_Tw.shape[0]
    n_rows = -(-N // LANE)                      # ceil(N / 128) sublane rows
    if n_rows <= MAX_BLOCK_ROWS:
        block_rows = n_rows                     # one grid step, full-extent block
    else:
        block_rows = MAX_BLOCK_ROWS             # multiple of 8 -> full vregs per step
    n_rows_pad = -(-n_rows // block_rows) * block_rows
    n_pad = n_rows_pad * LANE

    # Fused repack: single concat + single pad, component-major, sublane-packed.
    # Pad constant 1.0 keeps 1/x finite on padded lanes (those lanes are sliced off).
    packed = jnp.concatenate(
        [
            pos_Tw.T.astype(jnp.float32),                       # (3, N)
            kp2.T.astype(jnp.float32),                          # (2, N)
            jnp.reshape(kp2_disp.astype(jnp.float32), (1, N)),  # (1, N)
        ],
        axis=0,
    )
    packed = jnp.pad(packed, ((0, 0), (0, n_pad - N)), constant_values=1.0)
    packed = packed.reshape(6, n_rows_pad, LANE)

    t = pose7[:3].astype(jnp.float32)
    R = _quat_to_rotmat(pose7[3:7].astype(jnp.float32))
    fx, fy = K[0, 0], K[1, 1]
    cx, cy = K[0, 2], K[1, 2]
    params = jnp.concatenate(
        [R.reshape(-1), t, jnp.stack([fx, fy, cx, cy, fx * baseline])]
    ).astype(jnp.float32)

    out = pl.pallas_call(
        _pose_graph_disp_kernel,
        out_shape=jax.ShapeDtypeStruct((3, n_rows_pad, LANE), jnp.float32),
        grid=(n_rows_pad // block_rows,),
        in_specs=[
            pl.BlockSpec(memory_space=pltpu.MemorySpace.SMEM),          # pose/intrinsics
            pl.BlockSpec((6, block_rows, LANE), lambda i: (0, i, 0)),   # fused point data
        ],
        out_specs=pl.BlockSpec((3, block_rows, LANE), lambda i: (0, i, 0)),
        compiler_params=pltpu.CompilerParams(dimension_semantics=("parallel",)),
    )(params, packed)

    return out.reshape(3, n_pad)[:, :N].T  # (N, 3)


def _reference(pose7, pos_Tw, kp2, kp2_disp, K, baseline):
    R = _quat_to_rotmat(pose7[3:7])
    pc = (pos_Tw - pose7[:3]) @ R  # rows = R^T (p - t)
    u = K[0, 0] * pc[:, 1] / pc[:, 0] + K[0, 2]
    v = K[1, 1] * pc[:, 2] / pc[:, 0] + K[1, 2]
    reproj = jnp.stack([u, v], axis=-1) - kp2
    depth = (K[0, 0] * baseline) / pc[:, 0:1] - kp2_disp
    return jnp.concatenate([reproj, depth], axis=-1)


def _make_inputs(key, N):
    k1, k2, k3, k4, k5, k6 = jax.random.split(key, 6)
    t = (jax.random.normal(k1, (3,)) * 0.1).astype(jnp.float32)
    q = jax.random.normal(k2, (4,)) * 0.1 + jnp.array([0.0, 0.0, 0.0, 1.0])
    q = (q / jnp.linalg.norm(q)).astype(jnp.float32)
    pose7 = jnp.concatenate([t, q])  # SE3 param: [t, q]

    # world points with positive forward (x) component (NED: x = depth)
    pos_Tw = jnp.concatenate(
        [
            jax.random.uniform(k3, (N, 1), minval=2.0, maxval=10.0),
            jax.random.normal(k4, (N, 2)),
        ],
        axis=-1,
    ).astype(jnp.float32)

    kp2 = (jax.random.normal(k5, (N, 2)) * 5.0 + jnp.array([320.0, 240.0])).astype(jnp.float32)
    kp2_disparity = jax.random.uniform(k6, (N, 1), minval=1.0, maxval=20.0).astype(jnp.float32)

    K = jnp.array([[400.0, 0.0, 320.0], [0.0, 400.0, 240.0], [0.0, 0.0, 1.0]], jnp.float32)
    baseline = jnp.float32(0.1)
    return pose7, pos_Tw, kp2, kp2_disparity, K, baseline


if __name__ == "__main__":
    key = jax.random.PRNGKey(0)
    key_small, key_big = jax.random.split(key)

    # small case: single grid step (full-extent block)
    args = _make_inputs(key_small, 200)
    out = jax.block_until_ready(pose_graph_disparity_forward(*args))
    ref = _reference(*args)
    assert out.shape == (200, 3), out.shape
    assert jnp.allclose(out, ref, atol=1e-3, rtol=1e-3), float(jnp.max(jnp.abs(out - ref)))

    # larger case: exercises the multi-block (parallel grid) path
    args = _make_inputs(key_big, 5000)
    out = jax.block_until_ready(pose_graph_disparity_forward(*args))
    ref = _reference(*args)
    assert out.shape == (5000, 3), out.shape
    assert jnp.allclose(out, ref, atol=1e-3, rtol=1e-3), float(jnp.max(jnp.abs(out - ref)))

    print("KERNEL_OK")
</pallas_src>

<mosaic_0001>
module attributes {stable_mosaic.version = 11 : i64} {
  func.func @_pose_graph_disp_kernel(%arg0: i32, %arg1: memref<17xf32, #tpu.memory_space<smem>>, %arg2: memref<6x2x128xf32, #tpu.memory_space<vmem>>, %arg3: memref<3x2x128xf32, #tpu.memory_space<vmem>>) attributes {dimension_semantics = [#tpu.dimension_semantics<parallel>], iteration_bounds = array<i64: 1>, scalar_prefetch = 0 : i64, scratch_operands = 0 : i64, tpu.core_type = #tpu.core_type<tc>, window_params = [{transform_indices = @transform_0, window_bounds = array<i64: 17>}, {transform_indices = @transform_1, window_bounds = array<i64: 6, 2, 128>}, {transform_indices = @transform_2, window_bounds = array<i64: 3, 2, 128>}]} {
    %c0 = arith.constant 0 : index
    %0 = memref.load %arg1[%c0] : memref<17xf32, #tpu.memory_space<smem>>
    %c1 = arith.constant 1 : index
    %1 = memref.load %arg1[%c1] : memref<17xf32, #tpu.memory_space<smem>>
    %c2 = arith.constant 2 : index
    %2 = memref.load %arg1[%c2] : memref<17xf32, #tpu.memory_space<smem>>
    %c3 = arith.constant 3 : index
    %3 = memref.load %arg1[%c3] : memref<17xf32, #tpu.memory_space<smem>>
    %c4 = arith.constant 4 : index
    %4 = memref.load %arg1[%c4] : memref<17xf32, #tpu.memory_space<smem>>
    %c5 = arith.constant 5 : index
    %5 = memref.load %arg1[%c5] : memref<17xf32, #tpu.memory_space<smem>>
    %c6 = arith.constant 6 : index
    %6 = memref.load %arg1[%c6] : memref<17xf32, #tpu.memory_space<smem>>
    %c7 = arith.constant 7 : index
    %7 = memref.load %arg1[%c7] : memref<17xf32, #tpu.memory_space<smem>>
    %c8 = arith.constant 8 : index
    %8 = memref.load %arg1[%c8] : memref<17xf32, #tpu.memory_space<smem>>
    %c9 = arith.constant 9 : index
    %9 = memref.load %arg1[%c9] : memref<17xf32, #tpu.memory_space<smem>>
    %c10 = arith.constant 10 : index
    %10 = memref.load %arg1[%c10] : memref<17xf32, #tpu.memory_space<smem>>
    %c11 = arith.constant 11 : index
    %11 = memref.load %arg1[%c11] : memref<17xf32, #tpu.memory_space<smem>>
    %c12 = arith.constant 12 : index
    %12 = memref.load %arg1[%c12] : memref<17xf32, #tpu.memory_space<smem>>
    %c13 = arith.constant 13 : index
    %13 = memref.load %arg1[%c13] : memref<17xf32, #tpu.memory_space<smem>>
    %c14 = arith.constant 14 : index
    %14 = memref.load %arg1[%c14] : memref<17xf32, #tpu.memory_space<smem>>
    %c15 = arith.constant 15 : index
    %15 = memref.load %arg1[%c15] : memref<17xf32, #tpu.memory_space<smem>>
    %c16 = arith.constant 16 : index
    %16 = memref.load %arg1[%c16] : memref<17xf32, #tpu.memory_space<smem>>
    %c0_0 = arith.constant 0 : index
    %c0_1 = arith.constant 0 : index
    %c0_2 = arith.constant 0 : index
    %17 = vector.load %arg2[%c0_0, %c0_1, %c0_2] : memref<6x2x128xf32, #tpu.memory_space<vmem>>, vector<1x2x128xf32>
    %18 = vector.shape_cast %17 : vector<1x2x128xf32> to vector<2x128xf32>
    %19 = vector.broadcast %9 : f32 to vector<2x128xf32>
    %20 = arith.subf %18, %19 : vector<2x128xf32>
    %c1_3 = arith.constant 1 : index
    %c0_4 = arith.constant 0 : index
    %c0_5 = arith.constant 0 : index
    %21 = vector.load %arg2[%c1_3, %c0_4, %c0_5] : memref<6x2x128xf32, #tpu.memory_space<vmem>>, vector<1x2x128xf32>
    %22 = vector.shape_cast %21 : vector<1x2x128xf32> to vector<2x128xf32>
    %23 = vector.broadcast %10 : f32 to vector<2x128xf32>
    %24 = arith.subf %22, %23 : vector<2x128xf32>
    %c2_6 = arith.constant 2 : index
    %c0_7 = arith.constant 0 : index
    %c0_8 = arith.constant 0 : index
    %25 = vector.load %arg2[%c2_6, %c0_7, %c0_8] : memref<6x2x128xf32, #tpu.memory_space<vmem>>, vector<1x2x128xf32>
    %26 = vector.shape_cast %25 : vector<1x2x128xf32> to vector<2x128xf32>
    %27 = vector.broadcast %11 : f32 to vector<2x128xf32>
    %28 = arith.subf %26, %27 : vector<2x128xf32>
    %29 = vector.broadcast %0 : f32 to vector<2x128xf32>
    %30 = arith.mulf %29, %20 : vector<2x128xf32>
    %31 = vector.broadcast %3 : f32 to vector<2x128xf32>
    %32 = arith.mulf %31, %24 : vector<2x128xf32>
    %33 = arith.addf %30, %32 : vector<2x128xf32>
    %34 = vector.broadcast %6 : f32 to vector<2x128xf32>
    %35 = arith.mulf %34, %28 : vector<2x128xf32>
    %36 = arith.addf %33, %35 : vector<2x128xf32>
    %37 = vector.broadcast %1 : f32 to vector<2x128xf32>
    %38 = arith.mulf %37, %20 : vector<2x128xf32>
    %39 = vector.broadcast %4 : f32 to vector<2x128xf32>
    %40 = arith.mulf %39, %24 : vector<2x128xf32>
    %41 = arith.addf %38, %40 : vector<2x128xf32>
    %42 = vector.broadcast %7 : f32 to vector<2x128xf32>
    %43 = arith.mulf %42, %28 : vector<2x128xf32>
    %44 = arith.addf %41, %43 : vector<2x128xf32>
    %45 = vector.broadcast %2 : f32 to vector<2x128xf32>
    %46 = arith.mulf %45, %20 : vector<2x128xf32>
    %47 = vector.broadcast %5 : f32 to vector<2x128xf32>
    %48 = arith.mulf %47, %24 : vector<2x128xf32>
    %49 = arith.addf %46, %48 : vector<2x128xf32>
    %50 = vector.broadcast %8 : f32 to vector<2x128xf32>
    %51 = arith.mulf %50, %28 : vector<2x128xf32>
    %52 = arith.addf %49, %51 : vector<2x128xf32>
    %53 = tpu.reciprocal %36 : vector<2x128xf32> -> vector<2x128xf32>
    %54 = vector.broadcast %12 : f32 to vector<2x128xf32>
    %55 = arith.mulf %54, %44 : vector<2x128xf32>
    %56 = arith.mulf %55, %53 : vector<2x128xf32>
    %57 = vector.broadcast %14 : f32 to vector<2x128xf32>
    %58 = arith.addf %56, %57 : vector<2x128xf32>
    %c3_9 = arith.constant 3 : index
    %c0_10 = arith.constant 0 : index
    %c0_11 = arith.constant 0 : index
    %59 = vector.load %arg2[%c3_9, %c0_10, %c0_11] : memref<6x2x128xf32, #tpu.memory_space<vmem>>, vector<1x2x128xf32>
    %60 = vector.shape_cast %59 : vector<1x2x128xf32> to vector<2x128xf32>
    %61 = arith.subf %58, %60 : vector<2x128xf32>
    %c0_12 = arith.constant 0 : index
    %c0_13 = arith.constant 0 : index
    %c0_14 = arith.constant 0 : index
    %62 = vector.load %arg3[%c0_12, %c0_13, %c0_14] : memref<3x2x128xf32, #tpu.memory_space<vmem>>, vector<1x2x128xf32>
    %63 = vector.shape_cast %62 : vector<1x2x128xf32> to vector<2x128xf32>
    %64 = vector.shape_cast %61 : vector<2x128xf32> to vector<1x2x128xf32>
    tpu.vector_store %arg3[%c0_12, %c0_13, %c0_14], %64 {strides = array<i32>} : memref<3x2x128xf32, #tpu.memory_space<vmem>>, vector<1x2x128xf32>,
    %65 = vector.broadcast %13 : f32 to vector<2x128xf32>
    %66 = arith.mulf %65, %52 : vector<2x128xf32>
    %67 = arith.mulf %66, %53 : vector<2x128xf32>
    %68 = vector.broadcast %15 : f32 to vector<2x128xf32>
    %69 = arith.addf %67, %68 : vector<2x128xf32>
    %c4_15 = arith.constant 4 : index
    %c0_16 = arith.constant 0 : index
    %c0_17 = arith.constant 0 : index
    %70 = vector.load %arg2[%c4_15, %c0_16, %c0_17] : memref<6x2x128xf32, #tpu.memory_space<vmem>>, vector<1x2x128xf32>
    %71 = vector.shape_cast %70 : vector<1x2x128xf32> to vector<2x128xf32>
    %72 = arith.subf %69, %71 : vector<2x128xf32>
    %c1_18 = arith.constant 1 : index
    %c0_19 = arith.constant 0 : index
    %c0_20 = arith.constant 0 : index
    %73 = vector.load %arg3[%c1_18, %c0_19, %c0_20] : memref<3x2x128xf32, #tpu.memory_space<vmem>>, vector<1x2x128xf32>
    %74 = vector.shape_cast %73 : vector<1x2x128xf32> to vector<2x128xf32>
    %75 = vector.shape_cast %72 : vector<2x128xf32> to vector<1x2x128xf32>
    tpu.vector_store %arg3[%c1_18, %c0_19, %c0_20], %75 {strides = array<i32>} : memref<3x2x128xf32, #tpu.memory_space<vmem>>, vector<1x2x128xf32>,
    %76 = vector.broadcast %16 : f32 to vector<2x128xf32>
    %77 = arith.mulf %76, %53 : vector<2x128xf32>
    %c5_21 = arith.constant 5 : index
    %c0_22 = arith.constant 0 : index
    %c0_23 = arith.constant 0 : index
    %78 = vector.load %arg2[%c5_21, %c0_22, %c0_23] : memref<6x2x128xf32, #tpu.memory_space<vmem>>, vector<1x2x128xf32>
    %79 = vector.shape_cast %78 : vector<1x2x128xf32> to vector<2x128xf32>
    %80 = arith.subf %77, %79 : vector<2x128xf32>
    %c2_24 = arith.constant 2 : index
    %c0_25 = arith.constant 0 : index
    %c0_26 = arith.constant 0 : index
    %81 = vector.load %arg3[%c2_24, %c0_25, %c0_26] : memref<3x2x128xf32, #tpu.memory_space<vmem>>, vector<1x2x128xf32>
    %82 = vector.shape_cast %81 : vector<1x2x128xf32> to vector<2x128xf32>
    %83 = vector.shape_cast %80 : vector<2x128xf32> to vector<1x2x128xf32>
    tpu.vector_store %arg3[%c2_24, %c0_25, %c0_26], %83 {strides = array<i32>} : memref<3x2x128xf32, #tpu.memory_space<vmem>>, vector<1x2x128xf32>,
    return
  }
  func.func @transform_0(%arg0: i32) -> i32 {
    %c0_i32 = arith.constant 0 : i32
    %c0_i32_0 = arith.constant 0 : i32
    return %c0_i32 : i32
  }
  func.func @transform_1(%arg0: i32) -> (i32, i32, i32) {
    %c0_i32 = arith.constant 0 : i32
    %c0_i32_0 = arith.constant 0 : i32
    %c0_i32_1 = arith.constant 0 : i32
    return %c0_i32, %arg0, %c0_i32_0 : i32, i32, i32
  }
  func.func @transform_2(%arg0: i32) -> (i32, i32, i32) {
    %c0_i32 = arith.constant 0 : i32
    %c0_i32_0 = arith.constant 0 : i32
    %c0_i32_1 = arith.constant 0 : i32
    return %c0_i32, %arg0, %c0_i32_0 : i32, i32, i32
  }
}

</mosaic_0001>

<bundles_post_ra>
// kernel: pose_graph_disparity_forward.1
= control target key start
LH: loop header
LB: loop body
LE: loop exit
PB: predicated region body
PF: predicated region fallthrough
CT: control target
= control target key end

     0   :  { %7 = vsyncpa [#allocation3], 0  ;;  %s200_s0 = inlined_call_operand.vmem [shape: f32[17], index: 0, kind: input, shape index: {}]   ;;  %s201_s1 = inlined_call_operand.vmem [shape: f32[6,2,128], index: 1, kind: input, shape index: {}]   ;;  %s202_s2 = inlined_call_operand.vmem [shape: f32[3,2,128], index: 2, kind: output, shape index: {}]  }
   0x1   :  { %s14_s11 = sshll.u32 %s200_s0, 4  ;;  %s15_s11 = int_to_ptr.vmem [resolvable:$true] %s14_s11 }
   0x2   :  { %s134_s12 = scalar_lea.vmem %s15_s11, 16  ;;  %p139_p1 = scmp.lt.s32.totalorder %s15_s11, %s15_s11 }
   0x3   :  { %p135_p0 = scmp.ne.s32.totalorder %s15_s11, %s134_s12  ;;  %p140_p2 = scmp.lt.s32.totalorder %s134_s12, %s134_s12 }
   0x5   :  { %p141_p3 = por %p140_p2, %p139_p1 }
   0x7   :  { %p142_p4 = pnand %p141_p3, %p135_p0 }
   0x9   :  { %145 = shalt.err (!%p142_p4)
}
   0xa   :  { %s148_s13 = smov [#allocation2]  }
   0xb   :  { %17 = dma.vmem_to_smem %s15_s11, 16, %s148_s13, [#allocation3]  }
   0xc   :  { %146 = dma.done.wait [#allocation3], 16  }
   0xd   :  { %147 = vsyncadd [#allocation3], 4294967280 }
   0xe   :  { %23 = sfence }
   0xf   :  { %s24_s14 = sld [smem:[#allocation2]]  ;;  %s108_s15 = sld [smem:[#allocation2 + $0x1]]  ;;  %v41_v0 = vld [vmem:[%s201_s1] sm:$0x3]  ;;  %v124_v1 = vld [vmem:[%s201_s1 + $0x2] sm:$0x3] }
  0x10   :  { %s110_s16 = sld [smem:[#allocation2 + $0x3]]  ;;  %s111_s17 = sld [smem:[#allocation2 + $0x4]]  ;;  %v125_v2 = vld [vmem:[%s201_s1 + $0x4] sm:$0x3]  ;;  %v129_v41 = vld [vmem:[%s201_s1 + $0xa] sm:$0x3] }
  0x11   :  { %s113_s18 = sld [smem:[#allocation2 + $0x6]]  ;;  %s116_s19 = sld [smem:[#allocation2 + $0x9]]  ;;  %v126_v45 = vld [vmem:[%s201_s1 + $0x6] sm:$0x3]  ;;  %v127_v46 = vld [vmem:[%s201_s1 + $0x8] sm:$0x3] }
  0x12   :  { %s117_s0 = sld [smem:[#allocation2 + $0xa]]  ;;  %s118_s20 = sld [smem:[#allocation2 + $0xb]] }
  0x13   :  { %s167_s21 = sld [smem:[#allocation2 + $0x7]]  ;;  %s109_s22 = sld [smem:[#allocation2 + $0x2]] }
  0x14   :  { %s112_s23 = sld [smem:[#allocation2 + $0x5]]  ;;  %s169_s24 = sld [smem:[#allocation2 + $0x8]] }
  0x15   :  { %v52_v3 = vstv %s24_s14  ;;  %v60_v4 = vstv %s108_s15  ;;  %s119_s3 = sld [smem:[#allocation2 + $0xc]]  ;;  %s120_s4 = sld [smem:[#allocation2 + $0xd]] }
  0x16   :  { %v54_v7 = vstv %s110_s16  ;;  %v62_v8 = vstv %s111_s17  ;;  %s123_s5 = sld [smem:[#allocation2 + $0x10]]  ;;  %s121_s6 = sld [smem:[#allocation2 + $0xe]] }
  0x17   :  { %v42_v5 = vstv %s116_s19  ;;  %v57_v12 = vstv %s113_s18  ;;  %s122_s7 = sld [smem:[#allocation2 + $0xf]] }
  0x18   :  { %v46_v6 = vstv %s117_s0  ;;  %v43_v9 = vsub.f32 %v41_v0, %v42_v5  ;;  %v50_v11 = vstv %s118_s20 }
  0x19   :  { %v47_v10 = vsub.f32 %v124_v1, %v46_v6  ;;  %v51_v13 = vsub.f32 %v125_v2, %v50_v11  ;;  %v68_v14 = vstv %s109_s22  ;;  %v65_v23 = vstv %s167_s21 }
  0x1a   :  { %v53_v15 = vmul.f32 %v52_v3, %v43_v9  ;;  %v61_v17 = vmul.f32 %v60_v4, %v43_v9  ;;  %v69_v20 = vmul.f32 %v68_v14, %v43_v9  ;;  %v70_v21 = vstv %s112_s23 }
  0x1b   :  { %v55_v16 = vmul.f32 %v54_v7, %v47_v10  ;;  %v58_v18 = vmul.f32 %v57_v12, %v51_v13  ;;  %v63_v19 = vmul.f32 %v62_v8, %v47_v10  ;;  %v71_v24 = vmul.f32 %v70_v21, %v47_v10 }
  0x1c   :  { %v73_v25 = vstv %s169_s24  ;;  %v66_v28 = vmul.f32 %v65_v23, %v51_v13  ;;  %v77_v33 = vstv %s119_s3  ;;  %v86_v34 = vstv %s120_s4 }
  0x1d   :  { %v56_v22 = vadd.f32 %v55_v16, %v53_v15  ;;  %v64_v27 = vadd.f32 %v63_v19, %v61_v17  ;;  %v72_v29 = vadd.f32 %v71_v24, %v69_v20  ;;  %v74_v30 = vmul.f32 %v73_v25, %v51_v13 }
  0x1e   :  { %v96_v37 = vstv %s123_s5  ;;  %v80_v39 = vstv %s121_s6  ;;  %v89_v40 = vstv %s122_s7 }
  0x1f   :  { %v59_v26 = vadd.f32 %v58_v18, %v56_v22  ;;  %v67_v31 = vadd.f32 %v66_v28, %v64_v27  ;;  %v75_v32 = vadd.f32 %v74_v30, %v72_v29 }
  0x21   :  { %132 = vrcp.f32 %v59_v26  ;;  %v78_v35 = vmul.f32 %v77_v33, %v67_v31  ;;  %v87_v36 = vmul.f32 %v86_v34, %v75_v32 }
  0x2b   :  { %v133_v38 = vpop.eup %132 }
  0x2c   :  { %v79_v42 = vmul.f32 %v133_v38, %v78_v35  ;;  %v88_v43 = vmul.f32 %v133_v38, %v87_v36  ;;  %v97_v44 = vmul.f32 %v133_v38, %v96_v37 }
  0x2e   :  { %v81_v47 = vadd.f32 %v80_v39, %v79_v42  ;;  %v90_v48 = vadd.f32 %v89_v40, %v88_v43  ;;  %v100_v49 = vsub.f32 %v97_v44, %v129_v41 }
  0x30   :  { %v84_v50 = vsub.f32 %v81_v47, %v126_v45  ;;  %v93_v51 = vsub.f32 %v90_v48, %v127_v46  ;;  %130 = vst [vmem:[%s202_s2 + $0x4] sm:$0x3] %v100_v49 }
  0x32   :  { %85 = vst [vmem:[%s202_s2] sm:$0x3] %v84_v50  ;;  %128 = vst [vmem:[%s202_s2 + $0x2] sm:$0x3] %v93_v51 }
  0x33   :  { %107 = vsyncpa [#allocation3], 1 }

</bundles_post_ra>
